<compile_context>
chip_gen: v5e
topology: v5e:2x2
jax: 0.10.0
libtpu: 0.0.40
codegen_flags: <defaults>
</compile_context>

<pallas_src>
import functools

import jax
import jax.numpy as jnp
import numpy as np
from jax.experimental import pallas as pl
from jax.experimental.pallas import tpu as pltpu


def _opt_pos_enc_kernel(coords_ref, code_ref, out_ref, *, d, code_num):
    """One tile of TP points.

    coords_ref: (8, TP)            coords in [-1, 1]; rows >= d are zero padding
    code_ref:   (C, code_num**d)   code block of the selected shape (constant index_map,
                                   DMA'd once and resident across grid steps)
    out_ref:    (C, TP)            interpolated codes, lane-dense
    """
    tp = coords_ref.shape[1]
    cn = code_num

    # Map coords from [-1, 1] into grid space [0, cn - 1].
    scaled = (coords_ref[...] + 1.0) * ((cn - 1) / 2.0)                   # (8, TP)

    # int32 iota + one small convert (float iota lowering support varies across versions).
    grid_i = jax.lax.broadcasted_iota(jnp.int32, (cn, tp), 0).astype(jnp.float32)

    def hat(j):
        # 1-D linear-interpolation ("hat") weights for dimension j:
        #   hat(j)[i, p] = max(0, 1 - |i - scaled_j[p]|)
        # Nonzero only at i = floor(scaled_j) and floor(scaled_j) + 1, reproducing the
        # reference prod(1 - |coordsf|) weights exactly (including coords == +/-1).
        return jnp.maximum(0.0, 1.0 - jnp.abs(grid_i - scaled[j:j + 1, :]))   # (cn, TP)

    if d == 1:
        out_ref[...] = jnp.dot(code_ref[...], hat(0),
                               preferred_element_type=jnp.float32).astype(out_ref.dtype)
        return

    # Interpolation matrix over the low digits (dims 0..d-2):
    #   w_low[r, p] with r = sum_{j<d-1} digit_j * cn**j     -> shape (cn**(d-1), TP)
    w_low = hat(d - 2)
    for j in reversed(range(d - 2)):
        w_low = (w_low[:, None, :] * hat(j)[None, :, :]).reshape(w_low.shape[0] * cn, tp)

    # Most-significant digit fused into a K-tiled accumulation instead of building the
    # full (cn**d, TP) weight matrix.  Same MXU MACs, ~cn x smaller VMEM temporaries,
    # and the RHS (w_low) is shared by every dot.
    w_msd = hat(d - 1)                                                    # (cn, TP)
    kk = cn ** (d - 1)
    acc = None
    # Static unroll; fine for cn <= ~16.  TODO(synk): fori_loop / grid K-axis for cn >= 32.
    for i in range(cn):
        part = jnp.dot(code_ref[:, i * kk:(i + 1) * kk], w_low,
                       preferred_element_type=jnp.float32)               # (C, TP)
        part = part * w_msd[i:i + 1, :]
        acc = part if acc is None else acc + part
    out_ref[...] = acc.astype(out_ref.dtype)


@functools.partial(jax.jit, static_argnames=("code_num", "idx", "tile_p"))
def opt_pos_enc_vol(coords, shape_code, *, code_num, idx=0, tile_p=1024):
    """Pallas implementation of OptPosEncVol.forward.

    coords:     (B, P, in_features) float32 in [-1, 1]
    shape_code: (code_channel, shape_num * code_num**in_features) float32
    idx:        static python int shape index
    returns:    (B, P, code_channel) float32

    tile_p is sweepable (1024-2048 on v6e/v7x; keep <= 1024 on v5e's smaller scoped VMEM).
    """
    b, p, d = coords.shape
    c = shape_code.shape[0]
    nblk = code_num ** d

    npts = b * p
    tile_p = max(128, (int(tile_p) // 128) * 128)          # lane-aligned tiles only
    n128 = pl.cdiv(npts, 128)
    # Cap the tile so (a) tiny inputs aren't over-padded and (b) the grid has >= 2 steps
    # whenever there is enough work, so both v7x TensorCores get work (no-op on v5e/v6e).
    if n128 >= 2:
        tile_p = min(tile_p, (n128 // 2) * 128)
    else:
        tile_p = 128
    npts_pad = pl.cdiv(npts, tile_p) * tile_p
    d_pad = 8                                              # sublane-pad the coordinate dim

    # Per-dim coordinate rows along lanes keep the in-kernel hat-weight build and the
    # (C, TP) output lane-dense.  Under jit the transpose + pad fuse into one copy pass
    # (same HBM bytes as padding (npts, 8) directly, without an in-kernel XLU transpose).
    coords_flat = coords.reshape(npts, d).astype(jnp.float32)
    coords_t = jnp.pad(coords_flat.T, ((0, d_pad - d), (0, npts_pad - npts)))

    # Select the idx-th code block via the BlockSpec index_map (single DMA, no HBM copy).
    # Fall back to a wrapper slice only when the per-shape block is not lane-aligned.
    if shape_code.shape[1] == nblk or nblk % 128 == 0:
        code_in = shape_code.astype(jnp.float32)
        code_blk = int(idx)
    else:
        code_in = shape_code[:, int(idx) * nblk:(int(idx) + 1) * nblk].astype(jnp.float32)
        code_blk = 0

    # Explicit scoped-VMEM budget (v5e default is only 16 MiB); per-core estimate with 2x headroom.
    kk = code_num ** max(d - 1, 1)
    est_bytes = 4 * (
        2 * c * nblk                                        # code block (double-buffered)
        + 2 * d_pad * tile_p                                # coords tiles
        + 2 * c * tile_p                                    # output tiles
        + (d * code_num + 2 * kk + 4 * c) * tile_p          # hats, w_low (+bcast), acc/parts
    )
    vmem_limit = int(min(64 * 1024 * 1024, max(32 * 1024 * 1024, 2 * est_bytes)))

    kernel = functools.partial(_opt_pos_enc_kernel, d=d, code_num=code_num)

    out = pl.pallas_call(
        kernel,
        out_shape=jax.ShapeDtypeStruct((c, npts_pad), jnp.float32),
        grid=(npts_pad // tile_p,),
        in_specs=[
            pl.BlockSpec((d_pad, tile_p), lambda i: (0, i)),    # coord tile
            pl.BlockSpec((c, nblk), lambda i: (0, code_blk)),   # constant block: DMA'd once
        ],
        out_specs=pl.BlockSpec((c, tile_p), lambda i: (0, i)),  # lane-dense output
        compiler_params=pltpu.CompilerParams(
            dimension_semantics=("parallel",),
            vmem_limit_bytes=vmem_limit,
        ),
    )(coords_t, code_in)

    out = out[:, :npts]                       # (C, B*P)
    # NOTE: this transpose is a separate mem-bound pass; consumers that can accept
    # (C, B*P) directly should skip it (it fuses with downstream ops under jit).
    return out.T.reshape(b, p, c)             # (B, P, C)


def _reference_forward(coords, shape_code, *, code_num, idx=0):
    """Pure-JAX transcription of the PyTorch forward (for validation)."""
    b, p, d = coords.shape
    c = shape_code.shape[0]
    mask = jnp.stack(
        jnp.meshgrid(*([jnp.array([0.0, 1.0], jnp.float32)] * d), indexing="ij"), -1
    ).reshape(1, 1, -1, d)
    mul = jnp.array([code_num ** i for i in range(d)], jnp.int32)
    mul1 = idx * code_num ** d
    coords = (coords + 1.0) * ((code_num - 1) / 2.0)
    corners = jnp.floor(coords)[..., None, :] + mask
    coordsf = coords[..., None, :] - corners
    index = jnp.sum(corners.astype(jnp.int32) * mul, -1) + mul1      # (B, P, 2^d)
    weights = jnp.prod(1.0 - jnp.abs(coordsf), -1)                   # (B, P, 2^d)
    cc = shape_code[:, index.reshape(-1)].reshape(c, b, p, -1)
    out = jnp.sum(cc * weights, -1)
    return jnp.transpose(out, (1, 2, 0))


if __name__ == "__main__":
    # Small, module-consistent shapes (shape_num=2 / idx=1 exercises BlockSpec block
    # selection, pt_num=300 exercises point-axis padding and a 3-step grid at tile_p=256).
    in_features = 3
    code_num = 8
    code_channel = 32
    shape_num = 2
    batch, pt_num = 2, 300
    idx = 1

    key = jax.random.PRNGKey(0)
    k_coords, k_code = jax.random.split(key)

    coords = jax.random.uniform(
        k_coords, (batch, pt_num, in_features), jnp.float32, minval=-0.95, maxval=0.95
    )

    # Deterministic xavier_uniform init of shape_code (fan_out=C, fan_in=shape_num*code_num^d).
    ntot = shape_num * code_num ** in_features
    bound = float(np.sqrt(6.0 / (code_channel + ntot)))
    shape_code = jax.random.uniform(
        k_code, (code_channel, ntot), jnp.float32, minval=-bound, maxval=bound
    )

    out = opt_pos_enc_vol(coords, shape_code, code_num=code_num, idx=idx)
    out = jax.block_until_ready(out)

    ref = _reference_forward(coords, shape_code, code_num=code_num, idx=idx)
    np.testing.assert_allclose(np.asarray(out), np.asarray(ref), rtol=1e-4, atol=1e-4)
    assert out.shape == (batch, pt_num, code_channel)

    print("KERNEL_OK")
</pallas_src>

<mosaic_0001>
module attributes {stable_mosaic.version = 11 : i64} {
  func.func @_opt_pos_enc_kernel(%arg0: i32, %arg1: memref<8x256xf32, #tpu.memory_space<vmem>>, %arg2: memref<32x512xf32, #tpu.memory_space<vmem>>, %arg3: memref<32x256xf32, #tpu.memory_space<vmem>>) attributes {dimension_semantics = [#tpu.dimension_semantics<parallel>], iteration_bounds = array<i64: 3>, scalar_prefetch = 0 : i64, scratch_operands = 0 : i64, tpu.core_type = #tpu.core_type<tc>, window_params = [{transform_indices = @transform_0, window_bounds = array<i64: 8, 256>}, {transform_indices = @transform_1, window_bounds = array<i64: 32, 512>}, {transform_indices = @transform_2, window_bounds = array<i64: 32, 256>}]} {
    %c0 = arith.constant 0 : index
    %c0_0 = arith.constant 0 : index
    %0 = vector.load %arg1[%c0, %c0_0] : memref<8x256xf32, #tpu.memory_space<vmem>>, vector<8x256xf32>
    %cst = arith.constant 1.000000e+00 : f32
    %1 = vector.broadcast %cst : f32 to vector<8x256xf32>
    %2 = arith.addf %0, %1 : vector<8x256xf32>
    %cst_1 = arith.constant 3.500000e+00 : f32
    %3 = vector.broadcast %cst_1 : f32 to vector<8x256xf32>
    %4 = arith.mulf %2, %3 : vector<8x256xf32>
    %5 = tpu.iota {dimensions = array<i32: 0>} : vector<8x256xi32>
    %6 = arith.sitofp %5 : vector<8x256xi32> to vector<8x256xf32>
    %7 = vector.extract_strided_slice %4 {offsets = [1, 0], sizes = [1, 256], strides = [1, 1]} : vector<8x256xf32> to vector<1x256xf32>
    %8 = vector.broadcast %7 : vector<1x256xf32> to vector<8x256xf32>
    %9 = arith.subf %6, %8 : vector<8x256xf32>
    %10 = math.absf %9 : vector<8x256xf32>
    %cst_2 = arith.constant 1.000000e+00 : f32
    %11 = vector.broadcast %cst_2 : f32 to vector<8x256xf32>
    %12 = arith.subf %11, %10 : vector<8x256xf32>
    %cst_3 = arith.constant 0.000000e+00 : f32
    %13 = vector.broadcast %cst_3 : f32 to vector<8x256xf32>
    %14 = arith.maximumf %13, %12 : vector<8x256xf32>
    %15 = vector.shape_cast %14 : vector<8x256xf32> to vector<8x1x256xf32>
    %16 = vector.extract_strided_slice %4 {offsets = [0, 0], sizes = [1, 256], strides = [1, 1]} : vector<8x256xf32> to vector<1x256xf32>
    %17 = vector.broadcast %16 : vector<1x256xf32> to vector<8x256xf32>
    %18 = arith.subf %6, %17 : vector<8x256xf32>
    %19 = math.absf %18 : vector<8x256xf32>
    %cst_4 = arith.constant 1.000000e+00 : f32
    %20 = vector.broadcast %cst_4 : f32 to vector<8x256xf32>
    %21 = arith.subf %20, %19 : vector<8x256xf32>
    %cst_5 = arith.constant 0.000000e+00 : f32
    %22 = vector.broadcast %cst_5 : f32 to vector<8x256xf32>
    %23 = arith.maximumf %22, %21 : vector<8x256xf32>
    %24 = vector.shape_cast %23 : vector<8x256xf32> to vector<1x8x256xf32>
    %25 = vector.broadcast %15 : vector<8x1x256xf32> to vector<8x8x256xf32>
    %26 = vector.broadcast %24 : vector<1x8x256xf32> to vector<8x8x256xf32>
    %27 = arith.mulf %25, %26 : vector<8x8x256xf32>
    %28 = vector.shape_cast %27 : vector<8x8x256xf32> to vector<64x256xf32>
    %29 = vector.extract_strided_slice %4 {offsets = [2, 0], sizes = [1, 256], strides = [1, 1]} : vector<8x256xf32> to vector<1x256xf32>
    %30 = vector.broadcast %29 : vector<1x256xf32> to vector<8x256xf32>
    %31 = arith.subf %6, %30 : vector<8x256xf32>
    %32 = math.absf %31 : vector<8x256xf32>
    %cst_6 = arith.constant 1.000000e+00 : f32
    %33 = vector.broadcast %cst_6 : f32 to vector<8x256xf32>
    %34 = arith.subf %33, %32 : vector<8x256xf32>
    %cst_7 = arith.constant 0.000000e+00 : f32
    %35 = vector.broadcast %cst_7 : f32 to vector<8x256xf32>
    %36 = arith.maximumf %35, %34 : vector<8x256xf32>
    %c0_8 = arith.constant 0 : index
    %c0_9 = arith.constant 0 : index
    %37 = vector.load %arg2[%c0_8, %c0_9] : memref<32x512xf32, #tpu.memory_space<vmem>>, vector<32x64xf32>
    %cst_10 = arith.constant dense<0.000000e+00> : vector<32x256xf32>
    %38 = tpu.matmul %37, %28, %cst_10 {dimension_numbers = #tpu.dot_dimension_numbers<[1], [0], [0], [1], [0, 0, 1, 1], [], []>} : vector<32x64xf32>, vector<64x256xf32>, vector<32x256xf32> -> vector<32x256xf32>
    %39 = vector.extract_strided_slice %36 {offsets = [0, 0], sizes = [1, 256], strides = [1, 1]} : vector<8x256xf32> to vector<1x256xf32>
    %40 = vector.broadcast %39 : vector<1x256xf32> to vector<32x256xf32>
    %41 = arith.mulf %38, %40 : vector<32x256xf32>
    %c0_11 = arith.constant 0 : index
    %c64 = arith.constant 64 : index
    %42 = vector.load %arg2[%c0_11, %c64] : memref<32x512xf32, #tpu.memory_space<vmem>>, vector<32x64xf32>
    %cst_12 = arith.constant dense<0.000000e+00> : vector<32x256xf32>
    %43 = tpu.matmul %42, %28, %cst_12 {dimension_numbers = #tpu.dot_dimension_numbers<[1], [0], [0], [1], [0, 0, 1, 1], [], []>} : vector<32x64xf32>, vector<64x256xf32>, vector<32x256xf32> -> vector<32x256xf32>
    %44 = vector.extract_strided_slice %36 {offsets = [1, 0], sizes = [1, 256], strides = [1, 1]} : vector<8x256xf32> to vector<1x256xf32>
    %45 = vector.broadcast %44 : vector<1x256xf32> to vector<32x256xf32>
    %46 = arith.mulf %43, %45 : vector<32x256xf32>
    %47 = arith.addf %41, %46 : vector<32x256xf32>
    %c0_13 = arith.constant 0 : index
    %c128 = arith.constant 128 : index
    %48 = vector.load %arg2[%c0_13, %c128] : memref<32x512xf32, #tpu.memory_space<vmem>>, vector<32x64xf32>
    %cst_14 = arith.constant dense<0.000000e+00> : vector<32x256xf32>
    %49 = tpu.matmul %48, %28, %cst_14 {dimension_numbers = #tpu.dot_dimension_numbers<[1], [0], [0], [1], [0, 0, 1, 1], [], []>} : vector<32x64xf32>, vector<64x256xf32>, vector<32x256xf32> -> vector<32x256xf32>
    %50 = vector.extract_strided_slice %36 {offsets = [2, 0], sizes = [1, 256], strides = [1, 1]} : vector<8x256xf32> to vector<1x256xf32>
    %51 = vector.broadcast %50 : vector<1x256xf32> to vector<32x256xf32>
    %52 = arith.mulf %49, %51 : vector<32x256xf32>
    %53 = arith.addf %47, %52 : vector<32x256xf32>
    %c0_15 = arith.constant 0 : index
    %c192 = arith.constant 192 : index
    %54 = vector.load %arg2[%c0_15, %c192] : memref<32x512xf32, #tpu.memory_space<vmem>>, vector<32x64xf32>
    %cst_16 = arith.constant dense<0.000000e+00> : vector<32x256xf32>
    %55 = tpu.matmul %54, %28, %cst_16 {dimension_numbers = #tpu.dot_dimension_numbers<[1], [0], [0], [1], [0, 0, 1, 1], [], []>} : vector<32x64xf32>, vector<64x256xf32>, vector<32x256xf32> -> vector<32x256xf32>
    %56 = vector.extract_strided_slice %36 {offsets = [3, 0], sizes = [1, 256], strides = [1, 1]} : vector<8x256xf32> to vector<1x256xf32>
    %57 = vector.broadcast %56 : vector<1x256xf32> to vector<32x256xf32>
    %58 = arith.mulf %55, %57 : vector<32x256xf32>
    %59 = arith.addf %53, %58 : vector<32x256xf32>
    %c0_17 = arith.constant 0 : index
    %c256 = arith.constant 256 : index
    %60 = vector.load %arg2[%c0_17, %c256] : memref<32x512xf32, #tpu.memory_space<vmem>>, vector<32x64xf32>
    %cst_18 = arith.constant dense<0.000000e+00> : vector<32x256xf32>
    %61 = tpu.matmul %60, %28, %cst_18 {dimension_numbers = #tpu.dot_dimension_numbers<[1], [0], [0], [1], [0, 0, 1, 1], [], []>} : vector<32x64xf32>, vector<64x256xf32>, vector<32x256xf32> -> vector<32x256xf32>
    %62 = vector.extract_strided_slice %36 {offsets = [4, 0], sizes = [1, 256], strides = [1, 1]} : vector<8x256xf32> to vector<1x256xf32>
    %63 = vector.broadcast %62 : vector<1x256xf32> to vector<32x256xf32>
    %64 = arith.mulf %61, %63 : vector<32x256xf32>
    %65 = arith.addf %59, %64 : vector<32x256xf32>
    %c0_19 = arith.constant 0 : index
    %c320 = arith.constant 320 : index
    %66 = vector.load %arg2[%c0_19, %c320] : memref<32x512xf32, #tpu.memory_space<vmem>>, vector<32x64xf32>
    %cst_20 = arith.constant dense<0.000000e+00> : vector<32x256xf32>
    %67 = tpu.matmul %66, %28, %cst_20 {dimension_numbers = #tpu.dot_dimension_numbers<[1], [0], [0], [1], [0, 0, 1, 1], [], []>} : vector<32x64xf32>, vector<64x256xf32>, vector<32x256xf32> -> vector<32x256xf32>
    %68 = vector.extract_strided_slice %36 {offsets = [5, 0], sizes = [1, 256], strides = [1, 1]} : vector<8x256xf32> to vector<1x256xf32>
    %69 = vector.broadcast %68 : vector<1x256xf32> to vector<32x256xf32>
    %70 = arith.mulf %67, %69 : vector<32x256xf32>
    %71 = arith.addf %65, %70 : vector<32x256xf32>
    %c0_21 = arith.constant 0 : index
    %c384 = arith.constant 384 : index
    %72 = vector.load %arg2[%c0_21, %c384] : memref<32x512xf32, #tpu.memory_space<vmem>>, vector<32x64xf32>
    %cst_22 = arith.constant dense<0.000000e+00> : vector<32x256xf32>
    %73 = tpu.matmul %72, %28, %cst_22 {dimension_numbers = #tpu.dot_dimension_numbers<[1], [0], [0], [1], [0, 0, 1, 1], [], []>} : vector<32x64xf32>, vector<64x256xf32>, vector<32x256xf32> -> vector<32x256xf32>
    %74 = vector.extract_strided_slice %36 {offsets = [6, 0], sizes = [1, 256], strides = [1, 1]} : vector<8x256xf32> to vector<1x256xf32>
    %75 = vector.broadcast %74 : vector<1x256xf32> to vector<32x256xf32>
    %76 = arith.mulf %73, %75 : vector<32x256xf32>
    %77 = arith.addf %71, %76 : vector<32x256xf32>
    %c0_23 = arith.constant 0 : index
    %c448 = arith.constant 448 : index
    %78 = vector.load %arg2[%c0_23, %c448] : memref<32x512xf32, #tpu.memory_space<vmem>>, vector<32x64xf32>
    %cst_24 = arith.constant dense<0.000000e+00> : vector<32x256xf32>
    %79 = tpu.matmul %78, %28, %cst_24 {dimension_numbers = #tpu.dot_dimension_numbers<[1], [0], [0], [1], [0, 0, 1, 1], [], []>} : vector<32x64xf32>, vector<64x256xf32>, vector<32x256xf32> -> vector<32x256xf32>
    %80 = vector.extract_strided_slice %36 {offsets = [7, 0], sizes = [1, 256], strides = [1, 1]} : vector<8x256xf32> to vector<1x256xf32>
    %81 = vector.broadcast %80 : vector<1x256xf32> to vector<32x256xf32>
    %82 = arith.mulf %79, %81 : vector<32x256xf32>
    %83 = arith.addf %77, %82 : vector<32x256xf32>
    %c0_25 = arith.constant 0 : index
    %c0_26 = arith.constant 0 : index
    %84 = vector.load %arg3[%c0_25, %c0_26] : memref<32x256xf32, #tpu.memory_space<vmem>>, vector<32x256xf32>
    tpu.vector_store %arg3[%c0_25, %c0_26], %83 {strides = array<i32>} : memref<32x256xf32, #tpu.memory_space<vmem>>, vector<32x256xf32>,
    return
  }
  func.func @transform_0(%arg0: i32) -> (i32, i32) {
    %c0_i32 = arith.constant 0 : i32
    %c0_i32_0 = arith.constant 0 : i32
    return %c0_i32, %arg0 : i32, i32
  }
  func.func @transform_1(%arg0: i32) -> (i32, i32) {
    %c0_i32 = arith.constant 0 : i32
    %c1_i32 = arith.constant 1 : i32
    %c0_i32_0 = arith.constant 0 : i32
    return %c0_i32, %c1_i32 : i32, i32
  }
  func.func @transform_2(%arg0: i32) -> (i32, i32) {
    %c0_i32 = arith.constant 0 : i32
    %c0_i32_0 = arith.constant 0 : i32
    return %c0_i32, %arg0 : i32, i32
  }
}

</mosaic_0001>

<bundles_post_ra>
// kernel: opt_pos_enc_vol.1
= control target key start
LH: loop header
LB: loop body
LE: loop exit
PB: predicated region body
PF: predicated region fallthrough
CT: control target
= control target key end

     0   :  { %7 = vsyncpa [#allocation3], 0  ;;  %s1309_s9 = smov 0   ;;  %s1311_s10 = smov 0   ;;  %s1911_s0 = inlined_call_operand.vmem [shape: f32[8,768], index: 0, kind: input, shape index: {}]   ;;  %s1912_s1 = inlined_call_operand.hbm [shape: f32[32,1024], index: 1, kind: input, shape index: {}]   ;;  %s1913_s2 = inlined_call_operand.vmem [shape: f32[32,768], index: 2, kind: output, shape index: {}]  }
   0x1   :  { %s1313_s11 = smov 0  }
   0x2 LB: > { %s1322_s12 = sadd.s32 4294967295, %s1287_s11   ;;  %s1324_s13 = sadd.s32 1, %s1287_s11   ;;  %s1287_s11 = sphi %s1313_s11, %s1917_s11   ;;  %s1283_s10 = sphi %s1311_s10, %s1916_s10   ;;  %s1279_s9 = sphi %s1309_s9, %s1915_s9  }
   0x3   : > { %s64_s14 = ssub.s32 %s1287_s11, %s1324_s13  ;;  %s67_s15 = sadd.s32 1, %s1283_s10 }
   0x4   : > { %p65_p0 = scmp.eq.s32.totalorder %s64_s14, 0  ;;  %p77_p1 = scmp.ne.s32.totalorder %s1283_s10, %s1279_s9 }
   0x5   : > { %p78_p2 = scmp.eq.s32.totalorder %s1322_s12, 2  ;;  %p1114_p3 = scmp.ge.s32.totalorder %s1287_s11, 1 }
   0x6   : > { %s1332_s16 = scalar_select %p65_p0, %s1283_s10, %s67_s15  }
   0x7   : > { %p1334_p4 = por %p78_p2, %p77_p1  ;;  %p91_p5 = scmp.lt.s32.totalorder %s1287_s11, 4 }
   0x8   : > { %p1200_p6 = scmp.eq.s32.totalorder %s1322_s12, 0  ;;  %s102_s20 = scalar_lea.hbm %s1912_s1, 32 }
   0x9   : > { %p92_p7 = pnand %p1114_p3, %p91_p5  ;;  %s103_s21 = sshll.u32 %s102_s20, 4  ;;  %s104_s21 = int_to_ptr.hbm [resolvable:$true] %s103_s21 }
   0xa   : > { %s1289_s22 = smov [#allocation2]   ;;  %s1290_s24 = smov 1024  }
   0xb   : > { %p1196_p8 = pneg %p92_p7  ;;  %s105_s23 = sshll.u32 %s1289_s22, 4  ;;  %s106_s23 = int_to_ptr.vmem [resolvable:$true] %s105_s23 }
   0xc   : > { %s1291_s25 = smov 512   ;;  %s1292_s26 = smov 32  }
   0xd   : > { %p1197_p9 = pnand %p1200_p6, %p1196_p8  ;;  %130 = sbr.rel (%p92_p7) target bundleno = 404 (0x194), region = 28 }
   0xf   : > { %1199 = dma.hbm_to_vmem [thread:$0]  (!%p1197_p9), %s104_s21, 2048, %s106_s23, [#allocation3], %s1290_s24, %s1291_s25, %s1292_s26  }
  0x12   : > { %1274 = dma.done.wait (%p1200_p6), [#allocation3], 2048  }
  0x13   : > { %1276 = vsyncadd (%p1200_p6), [#allocation3], 4294965248  ;;  %s1120_s27 = sshll.u32 %s1322_s12, 1  ;;  %v165_v0 = vlaneseq  ;;  %v1349_v1 = vld [vmem:[#allocation2] sm:$0xff]  ;;  %s1293_s4 = smov 64   ;;  %v1360_v3 = vld [vmem:[#allocation2 + $0x8] sm:$0xff] }
  0x14   : > { %p153_p10 = scmp.lt.s32.totalorder %s1120_s27, 5  ;;  %v1351_v2 = vld [vmem:[#allocation2 + $0x40] sm:$0xff]  ;;  %357 = vrot.lane.b32.xlu0 %v1349_v1, %s1293_s4  ;;  %541 = vrot.lane.b32.xlu2 %v1360_v3, %s1293_s4  ;;  %v1374_v14 = vld [vmem:[#allocation2 + $0x28] sm:$0xff]  ;;  %v1394_v33 = vld [vmem:[#allocation2 + $0x10] sm:$0xff]  ;;  %vm201_vm0 = vcmask 1046528   ;;  %vm198_vm1 = vcmask 1046534  }
  0x15   : > { %361 = vrot.lane.b32.xlu1 %v1351_v2, %s1293_s4  ;;  %v166_v4 = vshrl.u32 %v165_v0, 7  ;;  %v1364_v9 = vld [vmem:[#allocation2 + $0x20] sm:$0xff]  ;;  %v1390_v27 = vld [vmem:[#allocation2 + $0x48] sm:$0xff]  ;;  %vm195_vm2 = vcmask 1045509   ;;  %vm192_vm3 = vcmask 1044484   ;;  %vm189_vm4 = vcmask 1043459  }
  0x16   : > { %s1919_s27 = smov (!%p153_p10, %s1120_s27), 5  ;;  %v1366_v10 = vld [vmem:[#allocation2 + $0x60] sm:$0xff]  ;;  %v1392_v28 = vld [vmem:[#allocation2 + $0x68] sm:$0xff]  ;;  %vm186_vm5 = vcmask 1042434   ;;  %vm183_vm6 = vcmask 1041409   ;;  %v1406_v47 = vld [vmem:[#allocation2 + $0x30] sm:$0xff] }
  0x17   : > { %s1121_s28 = sshll.u32 %s1919_s27, 3  ;;  %v1372_v13 = vcvt.s32.f32 %v166_v4  ;;  %v1408_v55 = vld [vmem:[#allocation2 + $0x50] sm:$0xff]  ;;  %vm181_vm7 = vcmask 1040384   ;;  %vm276_vm8 = vcmask 523264   ;;  %s149_s5 = sand.u32 1, %s1279_s9  }
  0x18   : > { %s156_s3 = scalar_lea.vmem %s1911_s0, %s1121_s28  ;;  %s1119_s6 = sshll.u32 %s149_s5, 6 }
  0x19   : > { %v159_v5 = vld [vmem:[%s156_s3] sm:$0xff]  ;;  %v160_v6 = vld [vmem:[%s156_s3 + $0x8] sm:$0xff]  ;;  %s1841_s7 = scalar_lea.vmem [#allocation4], %s1119_s6  ;;  %s1191_s8 = sshll.u32 (%p1334_p4), %s1322_s12, 4 }
  0x1a   : > { %v161_v7 = vadd.f32 1.0, %v159_v5  ;;  %v162_v8 = vadd.f32 1.0, %v160_v6  ;;  %s1018_s14 = scalar_lea.vmem (%p1334_p4), %s1913_s2, %s1191_s8 }
  0x1c   : > { %v1368_v11 = vmul.f32 3.5, %v161_v7  ;;  %v1370_v12 = vmul.f32 3.5, %v162_v8  ;;  %359 = vrot.lane.b32.xlu0 %v1364_v9, %s1293_s4  ;;  %543 = vrot.lane.b32.xlu2 %v1374_v14, %s1293_s4 }
  0x1d   : > { %363 = vrot.lane.b32.xlu1 %v1366_v10, %s1293_s4 }
  0x1e   : > { %v168_v15 = vperm.slane %v1368_v11, 1  ;;  %v169_v16 = vperm.slane %v1370_v12, 1  ;;  %v204_v17 = vperm.slane %v1368_v11, 0  ;;  %v205_v18 = vperm.slane %v1370_v12, 0 }
  0x20   : > { %v170_v19 = vsub.f32 %v1372_v13, %v168_v15  ;;  %v171_v20 = vsub.f32 %v1372_v13, %v169_v16  ;;  %v206_v21 = vsub.f32 %v1372_v13, %v204_v17  ;;  %v207_v22 = vsub.f32 %v1372_v13, %v205_v18 }
  0x22   : > { %v172_v23 = vand.u32 2147483647, %v170_v19  ;;  %v173_v24 = vand.u32 2147483647, %v171_v20  ;;  %v208_v25 = vand.u32 2147483647, %v206_v21 }
  0x23   : > { %v209_v26 = vand.u32 2147483647, %v207_v22 }
  0x24   : > { %v174_v29 = vsub.f32 1.0, %v172_v23  ;;  %v175_v30 = vsub.f32 1.0, %v173_v24  ;;  %v210_v31 = vsub.f32 1.0, %v208_v25  ;;  %545 = vrot.lane.b32.xlu0 %v1390_v27, %s1293_s4  ;;  %725 = vrot.lane.b32.xlu2 %v1394_v33, %s1293_s4  ;;  %v1455_v25 = vld [vmem:[#allocation2 + $0x18] sm:$0xff] }
  0x25   : > { %v211_v32 = vsub.f32 1.0, %v209_v26  ;;  %547 = vrot.lane.b32.xlu1 %v1392_v28, %s1293_s4  ;;  %v1457_v26 = vld [vmem:[#allocation2 + $0x38] sm:$0xff] }
  0x26   : > { %v176_v34 = vmax.f32 %v174_v29, 0.0  ;;  %v177_v35 = vmax.f32 %v175_v30, 0.0  ;;  %v1402_v37 = vmax.f32 %v210_v31, 0.0 }
  0x27   : > { %v1404_v38 = vmax.f32 %v211_v32, 0.0 }
  0x28   : > { %v180_v36 = vrot.slane %v177_v35, 7 }
  0x2a   : > { %v202_v39 = vsel %vm201_vm0, %v180_v36, %v176_v34  ;;  %v199_v40 = vsel %vm198_vm1, %v176_v34, %v180_v36  ;;  %v196_v41 = vsel %vm195_vm2, %v176_v34, %v180_v36  ;;  %v193_v42 = vsel %vm192_vm3, %v176_v34, %v180_v36 }
  0x2b   : > { %v203_v43 = vrot.slane %v202_v39, 7  ;;  %v200_v44 = vrot.slane %v199_v40, 6  ;;  %v197_v45 = vrot.slane %v196_v41, 5  ;;  %v194_v46 = vrot.slane %v193_v42, 4 }
  0x2c   : > { %v190_v48 = vsel %vm189_vm4, %v176_v34, %v180_v36  ;;  %v187_v49 = vsel %vm186_vm5, %v176_v34, %v180_v36  ;;  %v184_v50 = vsel %vm183_vm6, %v176_v34, %v180_v36  ;;  %727 = vrot.lane.b32.xlu0 %v1406_v47, %s1293_s4  ;;  %v182_v20 = vsel %vm181_vm7, %v176_v34, %v180_v36 }
  0x2d   : > { %v228_v51 = vperm.slane %v203_v43, 0  ;;  %v229_v52 = vperm.slane %v203_v43, 1  ;;  %v226_v53 = vperm.slane %v200_v44, 0  ;;  %v227_v54 = vperm.slane %v200_v44, 1  ;;  %729 = vrot.lane.b32.xlu1 %v1408_v55, %s1293_s4 }
  0x2e   : > { %v224_v56 = vperm.slane %v197_v45, 0  ;;  %v225_v57 = vperm.slane %v197_v45, 1  ;;  %v222_v58 = vperm.slane %v194_v46, 0  ;;  %v223_v59 = vperm.slane %v194_v46, 1 }
  0x2f   : > { %v1413_v60 = vmul.f32 %v228_v51, %v1402_v37  ;;  %v1416_v61 = vmul.f32 %v229_v52, %v1404_v38  ;;  %v1419_v62 = vmul.f32 %v226_v53, %v1402_v37  ;;  %v1422_v63 = vmul.f32 %v227_v54, %v1404_v38 }
  0x30   : > { %v1427_v0 = vmul.f32 %v224_v56, %v1402_v37  ;;  %v1432_v4 = vmul.f32 %v225_v57, %v1404_v38  ;;  %v191_v5 = vrot.slane %v190_v48, 3  ;;  %v188_v6 = vrot.slane %v187_v49, 2 }
  0x31   : > { %297 = vmatpush.msra.mxu0 %v1413_v60  ;;  %326 = vmatpush.msra.mxu1 %v1416_v61  ;;  %v185_v7 = vrot.slane %v184_v50, 1  ;;  %v1435_v8 = vmul.f32 %v222_v58, %v1402_v37  ;;  %v1438_v15 = vmul.f32 %v223_v59, %v1404_v38  ;;  %v214_v31 = vperm.slane %v182_v20, 0 }
  0x32   : > { %381 = vmatpush.msra.mxu2 %v1413_v60  ;;  %410 = vmatpush.msra.mxu3 %v1416_v61  ;;  %v220_v16 = vperm.slane %v191_v5, 0  ;;  %v221_v17 = vperm.slane %v191_v5, 1  ;;  %v218_v18 = vperm.slane %v188_v6, 0  ;;  %v219_v19 = vperm.slane %v188_v6, 1 }
  0x33   : > { %298 = vmatpush.msra.mxu0 %v1419_v62  ;;  %327 = vmatpush.msra.mxu1 %v1422_v63  ;;  %v216_v23 = vperm.slane %v185_v7, 0  ;;  %v217_v24 = vperm.slane %v185_v7, 1  ;;  %v215_v32 = vperm.slane %v182_v20, 1  ;;  %v1486_v36 = vmul.f32 %v214_v31, %v1402_v37 }
  0x34   : > { %382 = vmatpush.msra.mxu2 %v1419_v62  ;;  %411 = vmatpush.msra.mxu3 %v1422_v63  ;;  %v1450_v21 = vmul.f32 %v220_v16, %v1402_v37  ;;  %v1453_v22 = vmul.f32 %v221_v17, %v1404_v38  ;;  %v1464_v29 = vmul.f32 %v218_v18, %v1402_v37  ;;  %v262_v50 = vperm.slane %v1368_v11, 2 }
  0x35   : > { %299 = vmatpush.msra.mxu0 %v1427_v0  ;;  %328 = vmatpush.msra.mxu1 %v1432_v4  ;;  %v1467_v30 = vmul.f32 %v219_v19, %v1404_v38  ;;  %v1476_v34 = vmul.f32 %v216_v23, %v1402_v37  ;;  %v1479_v35 = vmul.f32 %v217_v24, %v1404_v38  ;;  %v1499_v37 = vld [vmem:[#allocation2 + $0x70] sm:$0xff]  ;;  %v263_v51 = vperm.slane %v1370_v12, 2 }
  0x36   : > { %383 = vmatpush.msra.mxu2 %v1427_v0  ;;  %412 = vmatpush.msra.mxu3 %v1432_v4  ;;  %v1489_v39 = vmul.f32 %v215_v32, %v1404_v38  ;;  %v264_v53 = vsub.f32 %v1372_v13, %v262_v50 }
  0x37   : > { %300 = vmatpush.msra.mxu0 %v1435_v8  ;;  %329 = vmatpush.msra.mxu1 %v1438_v15  ;;  %v265_v54 = vsub.f32 %v1372_v13, %v263_v51 }
  0x38   : > { %909 = vrot.lane.b32.xlu0 %v1455_v25, %s1293_s4  ;;  %911 = vrot.lane.b32.xlu1 %v1457_v26, %s1293_s4  ;;  %v266_v57 = vand.u32 2147483647, %v264_v53 }
  0x39   : > { %301 = vmatpush.msra.mxu0 %v1450_v21  ;;  %330 = vmatpush.msra.mxu1 %v1453_v22  ;;  %v267_v58 = vand.u32 2147483647, %v265_v54 }
  0x3a   : > { %384 = vmatpush.msra.mxu2 %v1435_v8  ;;  %413 = vmatpush.msra.mxu3 %v1438_v15 }
  0x3b   : > { %302 = vmatpush.msra.mxu0 %v1464_v29  ;;  %331 = vmatpush.msra.mxu1 %v1467_v30 }
  0x3c   : > { %385 = vmatpush.msra.mxu2 %v1450_v21  ;;  %414 = vmatpush.msra.mxu3 %v1453_v22 }
  0x3d   : > { %303 = vmatpush.msra.mxu0 %v1476_v34  ;;  %332 = vmatpush.msra.mxu1 %v1479_v35 }
  0x3e   : > { %386 = vmatpush.msra.mxu2 %v1464_v29  ;;  %415 = vmatpush.msra.mxu3 %v1467_v30 }
  0x3f   : > { %304 = vmatpush.msra.mxu0 %v1486_v36  ;;  %333 = vmatpush.msra.mxu1 %v1489_v39 }
  0x40   : > { %1122 = vmatmul.msk.f32.vlgmr.msra.gmra.mxu0 %vm276_vm8, %v1349_v1  ;;  %1126 = vmatmul.msk.f32.vlgmr.msra.gmra.mxu1 %vm276_vm8, %v1349_v1  ;;  %v1586_v1 = vld [vmem:[#allocation2 + $0x78] sm:$0xff] }
  0x41   : > { %473 = vmatpush.msrb.mxu0 %v1413_v60  ;;  %502 = vmatpush.msrb.mxu1 %v1416_v61 }
  0x42   : > { %731 = vrot.lane.b32.xlu2 %v1499_v37, %s1293_s4  ;;  %387 = vmatpush.msra.mxu2 %v1476_v34 }
  0x43   : > { %474 = vmatpush.msrb.mxu0 %v1419_v62  ;;  %503 = vmatpush.msrb.mxu1 %v1422_v63 }
  0x44   : > { %416 = vmatpush.msra.mxu3 %v1479_v35  ;;  %388 = vmatpush.msra.mxu2 %v1486_v36 }
  0x45   : > { %475 = vmatpush.msrb.mxu0 %v1427_v0  ;;  %504 = vmatpush.msrb.mxu1 %v1432_v4 }
  0x46   : > { %417 = vmatpush.msra.mxu3 %v1489_v39  ;;  %565 = vmatpush.msrb.mxu2 %v1413_v60 }
  0x47   : > { %476 = vmatpush.msrb.mxu0 %v1435_v8  ;;  %505 = vmatpush.msrb.mxu1 %v1438_v15 }
  0x48   : > { %1123 = vmatmul.msk.f32.gmra.mxu0 %vm276_vm8, %v1364_v9  ;;  %1127 = vmatmul.msk.f32.gmra.mxu1 %vm276_vm8, %v1364_v9 }
  0x49   : > { %594 = vmatpush.msrb.mxu3 %v1416_v61  ;;  %477 = vmatpush.msrb.mxu0 %v1450_v21 }
  0x4a   : > { %506 = vmatpush.msrb.mxu1 %v1453_v22  ;;  %566 = vmatpush.msrb.mxu2 %v1419_v62 }
  0x4b   : > { %478 = vmatpush.msrb.mxu0 %v1464_v29  ;;  %595 = vmatpush.msrb.mxu3 %v1422_v63 }
  0x4c   : > { %507 = vmatpush.msrb.mxu1 %v1467_v30  ;;  %567 = vmatpush.msrb.mxu2 %v1427_v0 }
  0x4d   : > { %479 = vmatpush.msrb.mxu0 %v1476_v34  ;;  %596 = vmatpush.msrb.mxu3 %v1432_v4 }
  0x4e   : > { %508 = vmatpush.msrb.mxu1 %v1479_v35  ;;  %568 = vmatpush.msrb.mxu2 %v1435_v8 }
  0x4f   : > { %480 = vmatpush.msrb.mxu0 %v1486_v36  ;;  %597 = vmatpush.msrb.mxu3 %v1438_v15 }
  0x50   : > { %1124 = vmatmul.msk.f32.gmra.mxu0 %vm276_vm8, %v1351_v2  ;;  %1128 = vmatmul.msk.f32.gmra.mxu1 %vm276_vm8, %v1351_v2  ;;  %v819_v2 = vld [vmem:[#allocation2 + $0x58] sm:$0xff] }
  0x51   : > { %509 = vmatpush.msrb.mxu1 %v1489_v39  ;;  %569 = vmatpush.msrb.mxu2 %v1450_v21 }
  0x52   : > { %598 = vmatpush.msrb.mxu3 %v1453_v22  ;;  %657 = vmatpush.msra.mxu0 %v1413_v60 }
  0x53   : > { %570 = vmatpush.msrb.mxu2 %v1464_v29  ;;  %686 = vmatpush.msra.mxu1 %v1416_v61 }
  0x54   : > { %599 = vmatpush.msrb.mxu3 %v1467_v30  ;;  %658 = vmatpush.msra.mxu0 %v1419_v62 }
  0x55   : > { %571 = vmatpush.msrb.mxu2 %v1476_v34  ;;  %687 = vmatpush.msra.mxu1 %v1422_v63 }
  0x56   : > { %600 = vmatpush.msrb.mxu3 %v1479_v35  ;;  %659 = vmatpush.msra.mxu0 %v1427_v0 }
  0x57   : > { %572 = vmatpush.msrb.mxu2 %v1486_v36  ;;  %688 = vmatpush.msra.mxu1 %v1432_v4 }
  0x58   : > { %1125 = vmatmul.msk.f32.gmra.mxu0 %vm276_vm8, %v1366_v10  ;;  %1129 = vmatmul.msk.f32.gmra.mxu1 %vm276_vm8, %v1366_v10 }
  0x59   : > { %601 = vmatpush.msrb.mxu3 %v1489_v39  ;;  %660 = vmatpush.msra.mxu0 %v1435_v8 }
  0x5a   : > { %689 = vmatpush.msra.mxu1 %v1438_v15  ;;  %915 = vrot.lane.b32.xlu0 %v1586_v1, %s1293_s4 }
  0x5b   : > { %661 = vmatpush.msra.mxu0 %v1450_v21  ;;  %913 = vrot.lane.b32.xlu2 %v819_v2, %s1293_s4 }
  0x5c   : > { %690 = vmatpush.msra.mxu1 %v1453_v22 }
  0x5d   : > { %662 = vmatpush.msra.mxu0 %v1464_v29 }
  0x5e   : > { %691 = vmatpush.msra.mxu1 %v1467_v30 }
  0x5f   : > { %663 = vmatpush.msra.mxu0 %v1476_v34 }
  0x60   : > { %1138 = vmatmul.msk.f32.vlgmr.msrb.gmra.mxu0 %vm276_vm8, %v1360_v3  ;;  %1142 = vmatmul.msk.f32.vlgmr.msrb.gmra.mxu1 %vm276_vm8, %v1360_v3 }
  0x61   : > { %692 = vmatpush.msra.mxu1 %v1479_v35  ;;  %664 = vmatpush.msra.mxu0 %v1486_v36 }
  0x63   : > { %841 = vmatpush.msrb.mxu0 %v1413_v60  ;;  %693 = vmatpush.msra.mxu1 %v1489_v39 }
  0x65   : > { %870 = vmatpush.msrb.mxu1 %v1416_v61  ;;  %842 = vmatpush.msrb.mxu0 %v1419_v62 }
  0x67   : > { %871 = vmatpush.msrb.mxu1 %v1422_v63  ;;  %843 = vmatpush.msrb.mxu0 %v1427_v0 }
  0x68   : > { %1139 = vmatmul.msk.f32.gmra.mxu0 %vm276_vm8, %v1374_v14  ;;  %1143 = vmatmul.msk.f32.gmra.mxu1 %vm276_vm8, %v1374_v14 }
  0x69   : > { %872 = vmatpush.msrb.mxu1 %v1432_v4  ;;  %844 = vmatpush.msrb.mxu0 %v1435_v8 }
  0x6b   : > { %873 = vmatpush.msrb.mxu1 %v1438_v15  ;;  %845 = vmatpush.msrb.mxu0 %v1450_v21 }
  0x6d   : > { %874 = vmatpush.msrb.mxu1 %v1453_v22  ;;  %846 = vmatpush.msrb.mxu0 %v1464_v29 }
  0x6f   : > { %875 = vmatpush.msrb.mxu1 %v1467_v30  ;;  %847 = vmatpush.msrb.mxu0 %v1476_v34 }
  0x70   : > { %1140 = vmatmul.msk.f32.gmra.mxu0 %vm276_vm8, %v1390_v27  ;;  %1144 = vmatmul.msk.f32.gmra.mxu1 %vm276_vm8, %v1390_v27  ;;  %v542_v27 = vpop.permute.xlu2 %541 }
  0x71   : > { %876 = vmatpush.msrb.mxu1 %v1479_v35  ;;  %848 = vmatpush.msrb.mxu0 %v1486_v36 }
  0x73   : > { %877 = vmatpush.msrb.mxu1 %v1489_v39 }
  0x78   : > { %1141 = vmatmul.msk.f32.gmra.mxu0 %vm276_vm8, %v1392_v28  ;;  %1145 = vmatmul.msk.f32.gmra.mxu1 %vm276_vm8, %v1392_v28  ;;  %v544_v28 = vpop.permute.xlu2 %543 }
  0x80   : > { %1154 = vmatmul.msk.f32.vlgmr.msra.gmra.mxu0 %vm276_vm8, %v1394_v33  ;;  %1158 = vmatmul.msk.f32.vlgmr.msra.gmra.mxu1 %vm276_vm8, %v1394_v33  ;;  %v726_v40 = vpop.permute.xlu2 %725 }
  0x86   : > { %v358_v3 = vpop.permute.xlu0 %357 }
  0x87   : > { %1130 = vmatmul.msk.f32.vlgmr.msra.gmra.mxu2 %vm276_vm8, %v358_v3  ;;  %1134 = vmatmul.msk.f32.vlgmr.msra.gmra.mxu3 %vm276_vm8, %v358_v3  ;;  %v362_v10 = vpop.permute.xlu1 %361 }
  0x88   : > { %1155 = vmatmul.msk.f32.gmra.mxu0 %vm276_vm8, %v1406_v47  ;;  %1159 = vmatmul.msk.f32.gmra.mxu1 %vm276_vm8, %v1406_v47 }
  0x89   : > { %749 = vmatpush.msra.mxu2 %v1413_v60  ;;  %778 = vmatpush.msra.mxu3 %v1416_v61 }
  0x8b   : > { %750 = vmatpush.msra.mxu2 %v1419_v62  ;;  %779 = vmatpush.msra.mxu3 %v1422_v63 }
  0x8d   : > { %751 = vmatpush.msra.mxu2 %v1427_v0  ;;  %780 = vmatpush.msra.mxu3 %v1432_v4 }
  0x8e   : > { %v360_v9 = vpop.permute.xlu0 %359 }
  0x8f   : > { %752 = vmatpush.msra.mxu2 %v1435_v8  ;;  %781 = vmatpush.msra.mxu3 %v1438_v15  ;;  %v364_v14 = vpop.permute.xlu1 %363 }
  0x90   : > { %1156 = vmatmul.msk.f32.gmra.mxu0 %vm276_vm8, %v1408_v55  ;;  %1160 = vmatmul.msk.f32.gmra.mxu1 %vm276_vm8, %v1408_v55 }
  0x91   : > { %1131 = vmatmul.msk.f32.gmra.mxu2 %vm276_vm8, %v360_v9  ;;  %1135 = vmatmul.msk.f32.gmra.mxu3 %vm276_vm8, %v360_v9 }
  0x92   : > { %753 = vmatpush.msra.mxu2 %v1450_v21  ;;  %782 = vmatpush.msra.mxu3 %v1453_v22 }
  0x94   : > { %754 = vmatpush.msra.mxu2 %v1464_v29  ;;  %783 = vmatpush.msra.mxu3 %v1467_v30 }
  0x96   : > { %755 = vmatpush.msra.mxu2 %v1476_v34  ;;  %784 = vmatpush.msra.mxu3 %v1479_v35  ;;  %v546_v33 = vpop.permute.xlu0 %545 }
  0x97   : > { %v548_v38 = vpop.permute.xlu1 %547 }
  0x98   : > { %1157 = vmatmul.msk.f32.gmra.mxu0 %vm276_vm8, %v1499_v37  ;;  %1161 = vmatmul.msk.f32.gmra.mxu1 %vm276_vm8, %v1499_v37 }
  0x99   : > { %756 = vmatpush.msra.mxu2 %v1486_v36  ;;  %785 = vmatpush.msra.mxu3 %v1489_v39 }
  0x9a   : > { %1132 = vmatmul.msk.f32.gmra.mxu2 %vm276_vm8, %v362_v10  ;;  %1136 = vmatmul.msk.f32.gmra.mxu3 %vm276_vm8, %v362_v10 }
  0x9c   : > { %v732_v43 = vpop.permute.xlu2 %731 }
  0x9e   : > { %v728_v41 = vpop.permute.xlu0 %727 }
  0x9f   : > { %v730_v42 = vpop.permute.xlu1 %729 }
  0xa0   : > { %1170 = vmatmul.msk.f32.vlgmr.msrb.gmra.mxu0 %vm276_vm8, %v1455_v25  ;;  %1174 = vmatmul.msk.f32.vlgmr.msrb.gmra.mxu1 %vm276_vm8, %v1455_v25 }
  0xa2   : > { %1133 = vmatmul.msk.f32.gmra.mxu2 %vm276_vm8, %v364_v14  ;;  %1137 = vmatmul.msk.f32.gmra.mxu3 %vm276_vm8, %v364_v14 }
  0xa8   : > { %1171 = vmatmul.msk.f32.gmra.mxu0 %vm276_vm8, %v1457_v26  ;;  %1175 = vmatmul.msk.f32.gmra.mxu1 %vm276_vm8, %v1457_v26 }
  0xaa   : > { %1146 = vmatmul.msk.f32.vlgmr.msrb.gmra.mxu2 %vm276_vm8, %v542_v27  ;;  %1150 = vmatmul.msk.f32.vlgmr.msrb.gmra.mxu3 %vm276_vm8, %v542_v27  ;;  %v910_v44 = vpop.permute.xlu0 %909  ;;  %v912_v47 = vpop.permute.xlu1 %911 }
  0xab   : > { %933 = vmatpush.msrb.mxu2 %v1413_v60  ;;  %962 = vmatpush.msrb.mxu3 %v1416_v61  ;;  %v268_v60 = vsub.f32 1.0, %v266_v57  ;;  %v269_v61 = vsub.f32 1.0, %v267_v58 }
  0xad   : > { %934 = vmatpush.msrb.mxu2 %v1419_v62  ;;  %963 = vmatpush.msrb.mxu3 %v1422_v63  ;;  %v1706_v11 = vmax.f32 %v268_v60, 0.0  ;;  %v1708_v12 = vmax.f32 %v269_v61, 0.0 }
  0xaf   : > { %935 = vmatpush.msrb.mxu2 %v1427_v0  ;;  %964 = vmatpush.msrb.mxu3 %v1432_v4  ;;  %v347_v63 = vperm.slane %v1706_v11, 0  ;;  %v348_v0 = vperm.slane %v1708_v12, 0  ;;  %v431_v4 = vperm.slane %v1706_v11, 1  ;;  %v432_v5 = vperm.slane %v1708_v12, 1 }
  0xb0   : > { %1172 = vmatmul.msk.f32.gmra.mxu0 %vm276_vm8, %v819_v2  ;;  %1176 = vmatmul.msk.f32.gmra.mxu1 %vm276_vm8, %v819_v2 }
  0xb1   : > { %936 = vmatpush.msrb.mxu2 %v1435_v8  ;;  %965 = vmatpush.msrb.mxu3 %v1438_v15 }
  0xb2   : > { %1147 = vmatmul.msk.f32.gmra.mxu2 %vm276_vm8, %v544_v28  ;;  %1151 = vmatmul.msk.f32.gmra.mxu3 %vm276_vm8, %v544_v28 }
  0xb3   : > { %937 = vmatpush.msrb.mxu2 %v1450_v21  ;;  %966 = vmatpush.msrb.mxu3 %v1453_v22 }
  0xb5   : > { %938 = vmatpush.msrb.mxu2 %v1464_v29  ;;  %967 = vmatpush.msrb.mxu3 %v1467_v30  ;;  %v914_v52 = vpop.permute.xlu2 %913 }
  0xb7   : > { %939 = vmatpush.msrb.mxu2 %v1476_v34  ;;  %968 = vmatpush.msrb.mxu3 %v1479_v35 }
  0xb8   : > { %1173 = vmatmul.msk.f32.gmra.mxu0 %vm276_vm8, %v1586_v1  ;;  %1177 = vmatmul.msk.f32.gmra.mxu1 %vm276_vm8, %v1586_v1 }
  0xb9   : > { %940 = vmatpush.msrb.mxu2 %v1486_v36  ;;  %969 = vmatpush.msrb.mxu3 %v1489_v39 }
  0xba   : > { %1148 = vmatmul.msk.f32.gmra.mxu2 %vm276_vm8, %v546_v33  ;;  %1152 = vmatmul.msk.f32.gmra.mxu3 %vm276_vm8, %v546_v33 }
  0xbd   : > { %v306_v45 = vpop.f32.mrf.mxu0  ;;  %v335_v46 = vpop.f32.mrf.mxu1 }
  0xbe   : > { %v349_v8 = vmul.f32 %v347_v63, %v306_v45  ;;  %v350_v15 = vmul.f32 %v348_v0, %v335_v46 }
  0xc2   : > { %1149 = vmatmul.msk.f32.gmra.mxu2 %vm276_vm8, %v548_v38  ;;  %1153 = vmatmul.msk.f32.gmra.mxu3 %vm276_vm8, %v548_v38 }
  0xc5   : > { %v309_v48 = vpop.f32.mrf.mxu0  ;;  %v338_v49 = vpop.f32.mrf.mxu1 }
  0xc6   : > { %v351_v24 = vmul.f32 %v347_v63, %v309_v48  ;;  %v352_v25 = vmul.f32 %v348_v0, %v338_v49 }
  0xca   : > { %1162 = vmatmul.msk.f32.vlgmr.msra.gmra.mxu2 %vm276_vm8, %v726_v40  ;;  %1166 = vmatmul.msk.f32.vlgmr.msra.gmra.mxu3 %vm276_vm8, %v726_v40 }
  0xcc   : > { %v916_v59 = vpop.permute.xlu0 %915 }
  0xcd   : > { %v312_v55 = vpop.f32.mrf.mxu0  ;;  %v341_v56 = vpop.f32.mrf.mxu1 }
  0xce   : > { %v353_v39 = vmul.f32 %v347_v63, %v312_v55  ;;  %v354_v37 = vmul.f32 %v348_v0, %v341_v56 }
  0xd2   : > { %1163 = vmatmul.msk.f32.gmra.mxu2 %vm276_vm8, %v728_v41  ;;  %1167 = vmatmul.msk.f32.gmra.mxu3 %vm276_vm8, %v728_v41 }
  0xd5   : > { %v315_v13 = vpop.f32.mrf.mxu0  ;;  %v344_v62 = vpop.f32.mrf.mxu1 }
  0xd6   : > { %v355_v33 = vmul.f32 %v347_v63, %v315_v13  ;;  %v356_v38 = vmul.f32 %v348_v0, %v344_v62 }
  0xda   : > { %1164 = vmatmul.msk.f32.gmra.mxu2 %vm276_vm8, %v730_v42  ;;  %1168 = vmatmul.msk.f32.gmra.mxu3 %vm276_vm8, %v730_v42 }
  0xdd   : > { %v482_v20 = vpop.f32.mrf.mxu0  ;;  %v511_v21 = vpop.f32.mrf.mxu1 }
  0xe2   : > { %1165 = vmatmul.msk.f32.gmra.mxu2 %vm276_vm8, %v732_v43  ;;  %1169 = vmatmul.msk.f32.gmra.mxu3 %vm276_vm8, %v732_v43 }
  0xe5   : > { %v1722_v32 = vpop.f32.mrf.mxu0  ;;  %v1724_v34 = vpop.f32.mrf.mxu1 }
  0xea   : > { %1178 = vmatmul.msk.f32.vlgmr.msrb.gmra.mxu2 %vm276_vm8, %v910_v44  ;;  %1182 = vmatmul.msk.f32.vlgmr.msrb.gmra.mxu3 %vm276_vm8, %v910_v44 }
  0xed   : > { %v1730_v10 = vpop.f32.mrf.mxu0  ;;  %v1732_v14 = vpop.f32.mrf.mxu1 }
  0xf2   : > { %1179 = vmatmul.msk.f32.gmra.mxu2 %vm276_vm8, %v912_v47  ;;  %1183 = vmatmul.msk.f32.gmra.mxu3 %vm276_vm8, %v912_v47 }
  0xf5   : > { %v1738_v46 = vpop.f32.mrf.mxu0  ;;  %v1740_v47 = vpop.f32.mrf.mxu1 }
  0xfa   : > { %1180 = vmatmul.msk.f32.gmra.mxu2 %vm276_vm8, %v914_v52  ;;  %1184 = vmatmul.msk.f32.gmra.mxu3 %vm276_vm8, %v914_v52 }
  0xfd   : > { %v666_v50 = vpop.f32.mrf.mxu0  ;;  %v695_v51 = vpop.f32.mrf.mxu1 }
 0x102   : > { %1181 = vmatmul.msk.f32.gmra.mxu2 %vm276_vm8, %v916_v59  ;;  %1185 = vmatmul.msk.f32.gmra.mxu3 %vm276_vm8, %v916_v59 }
 0x105   : > { %v669_v54 = vpop.f32.mrf.mxu0  ;;  %v698_v55 = vpop.f32.mrf.mxu1 }
 0x10a   : > { %v390_v6 = vpop.f32.mrf.mxu2  ;;  %v419_v7 = vpop.f32.mrf.mxu3 }
 0x10b   : > { %v433_v16 = vmul.f32 %v431_v4, %v390_v6  ;;  %v434_v17 = vmul.f32 %v432_v5, %v419_v7  ;;  %v1765_v6 = vperm.slane %v1706_v11, 3  ;;  %v1768_v7 = vperm.slane %v1708_v12, 3 }
 0x10d   : > { %v1714_v18 = vadd.f32 %v433_v16, %v349_v8  ;;  %v1716_v19 = vadd.f32 %v434_v17, %v350_v15  ;;  %v1750_v58 = vpop.f32.mrf.mxu0  ;;  %v1752_v59 = vpop.f32.mrf.mxu1 }
 0x114   : > { %v393_v22 = vpop.f32.mrf.mxu2  ;;  %v422_v23 = vpop.f32.mrf.mxu3 }
 0x115   : > { %v435_v26 = vmul.f32 %v431_v4, %v393_v22  ;;  %v436_v29 = vmul.f32 %v432_v5, %v422_v23  ;;  %v1754_v63 = vpop.f32.mrf.mxu0  ;;  %v1756_v0 = vpop.f32.mrf.mxu1 }
 0x117   : > { %v1718_v30 = vadd.f32 %v435_v26, %v351_v24  ;;  %v1720_v31 = vadd.f32 %v436_v29, %v352_v25  ;;  %v1779_v24 = vperm.slane %v1706_v11, 4  ;;  %v1782_v25 = vperm.slane %v1708_v12, 4 }
 0x11d   : > { %v396_v35 = vpop.f32.mrf.mxu2  ;;  %v425_v36 = vpop.f32.mrf.mxu3 }
 0x11e   : > { %v437_v1 = vmul.f32 %v431_v4, %v396_v35  ;;  %v438_v2 = vmul.f32 %v432_v5, %v425_v36  ;;  %v850_v26 = vpop.f32.mrf.mxu0  ;;  %v879_v29 = vpop.f32.mrf.mxu1  ;;  %v1787_v35 = vperm.slane %v1706_v11, 5  ;;  %v1790_v36 = vperm.slane %v1708_v12, 5 }
 0x120   : > { %v1726_v3 = vadd.f32 %v437_v1, %v353_v39  ;;  %v1728_v9 = vadd.f32 %v438_v2, %v354_v37  ;;  %v709_v1 = vmul.f32 %v1779_v24, %v666_v50  ;;  %v710_v2 = vmul.f32 %v1782_v25, %v695_v51 }
 0x125   : > { %v399_v27 = vpop.f32.mrf.mxu2  ;;  %v428_v28 = vpop.f32.mrf.mxu3 }
 0x126   : > { %v439_v40 = vmul.f32 %v431_v4, %v399_v27  ;;  %v440_v41 = vmul.f32 %v432_v5, %v428_v28  ;;  %v1759_v4 = vperm.slane %v1706_v11, 2  ;;  %v1762_v5 = vperm.slane %v1708_v12, 2 }
 0x128   : > { %v1734_v42 = vadd.f32 %v439_v40, %v355_v33  ;;  %v1736_v43 = vadd.f32 %v440_v41, %v356_v38  ;;  %v525_v8 = vmul.f32 %v1759_v4, %v482_v20  ;;  %v526_v15 = vmul.f32 %v1762_v5, %v511_v21 }
 0x129   : > { %v527_v40 = vmul.f32 %v1759_v4, %v1722_v32  ;;  %v528_v41 = vmul.f32 %v1762_v5, %v1724_v34  ;;  %v1818_v34 = vperm.slane %v1706_v11, 7 }
 0x12a   : > { %v533_v20 = vadd.f32 %v525_v8, %v1714_v18  ;;  %v534_v21 = vadd.f32 %v526_v15, %v1716_v19  ;;  %v1797_v18 = vperm.slane %v1706_v11, 6  ;;  %v1800_v19 = vperm.slane %v1708_v12, 6 }
 0x12b   : > { %v536_v32 = vadd.f32 %v528_v41, %v1720_v31  ;;  %v530_v31 = vmul.f32 %v1762_v5, %v1732_v14 }
 0x12c   : > { %v893_v8 = vmul.f32 %v1797_v18, %v850_v26  ;;  %v894_v15 = vmul.f32 %v1800_v19, %v879_v29  ;;  %v712_v26 = vmul.f32 %v1782_v25, %v698_v55 }
 0x12d   : > { %v574_v44 = vpop.f32.mrf.mxu2  ;;  %v603_v45 = vpop.f32.mrf.mxu3 }
 0x12e   : > { %v617_v22 = vmul.f32 %v1765_v6, %v574_v44  ;;  %v618_v23 = vmul.f32 %v1768_v7, %v603_v45 }
 0x130   : > { %v625_v39 = vadd.f32 %v617_v22, %v533_v20  ;;  %v626_v37 = vadd.f32 %v618_v23, %v534_v21  ;;  %v535_v22 = vadd.f32 %v527_v40, %v1718_v30  ;;  %v853_v23 = vpop.f32.mrf.mxu0  ;;  %v882_v20 = vpop.f32.mrf.mxu1  ;;  %v529_v30 = vmul.f32 %v1759_v4, %v1730_v10 }
 0x132   : > { %v717_v44 = vadd.f32 %v709_v1, %v625_v39  ;;  %v718_v45 = vadd.f32 %v710_v2, %v626_v37  ;;  %v711_v39 = vmul.f32 %v1779_v24, %v669_v54 }
 0x135   : > { %v577_v48 = vpop.f32.mrf.mxu2  ;;  %v606_v49 = vpop.f32.mrf.mxu3 }
 0x136   : > { %v619_v50 = vmul.f32 %v1765_v6, %v577_v48  ;;  %v620_v51 = vmul.f32 %v1768_v7, %v606_v49  ;;  %v1821_v48 = vperm.slane %v1708_v12, 7 }
 0x138   : > { %v627_v49 = vadd.f32 %v619_v50, %v535_v22  ;;  %v628_v21 = vadd.f32 %v620_v51, %v536_v32  ;;  %v895_v50 = vmul.f32 %v1797_v18, %v853_v23  ;;  %v896_v51 = vmul.f32 %v1800_v19, %v882_v20 }
 0x13a   : > { %v720_v14 = vadd.f32 %v712_v26, %v628_v21 }
 0x13d   : > { %v1742_v52 = vpop.f32.mrf.mxu2  ;;  %v1744_v53 = vpop.f32.mrf.mxu3 }
 0x13e   : > { %v621_v55 = vmul.f32 %v1765_v6, %v1742_v52  ;;  %v622_v10 = vmul.f32 %v1768_v7, %v1744_v53 }
 0x145   : > { %v1746_v56 = vpop.f32.mrf.mxu2  ;;  %v1748_v57 = vpop.f32.mrf.mxu3 }
 0x14d   : > { %v758_v60 = vpop.f32.mrf.mxu2  ;;  %v787_v61 = vpop.f32.mrf.mxu3 }
 0x14e   : > { %v801_v27 = vmul.f32 %v1787_v35, %v758_v60  ;;  %v802_v28 = vmul.f32 %v1790_v36, %v787_v61 }
 0x150   : > { %v809_v60 = vadd.f32 %v801_v27, %v717_v44  ;;  %v810_v61 = vadd.f32 %v802_v28, %v718_v45  ;;  %v719_v28 = vadd.f32 %v711_v39, %v627_v49  ;;  %v537_v44 = vadd.f32 %v529_v30, %v1726_v3 }
 0x151   : > { %v714_v3 = vmul.f32 %v1782_v25, %v1752_v59 }
 0x152   : > { %v901_v29 = vadd.f32 %v893_v8, %v809_v60  ;;  %v902_v37 = vadd.f32 %v894_v15, %v810_v61  ;;  %v629_v52 = vadd.f32 %v621_v55, %v537_v44  ;;  %v713_v60 = vmul.f32 %v1779_v24, %v1750_v58  ;;  %v885_v61 = vpop.f32.mrf.mxu1 }
 0x153   : > { %v531_v8 = vmul.f32 %v1759_v4, %v1738_v46  ;;  %v532_v15 = vmul.f32 %v1762_v5, %v1740_v47  ;;  %v623_v47 = vmul.f32 %v1765_v6, %v1746_v56  ;;  %v624_v5 = vmul.f32 %v1768_v7, %v1748_v57 }
 0x154   : > { %v721_v46 = vadd.f32 %v713_v60, %v629_v52  ;;  %v715_v56 = vmul.f32 %v1779_v24, %v1754_v63  ;;  %v716_v57 = vmul.f32 %v1782_v25, %v1756_v0 }
 0x155   : > { %v761_v13 = vpop.f32.mrf.mxu2  ;;  %v790_v62 = vpop.f32.mrf.mxu3 }
 0x156   : > { %v803_v12 = vmul.f32 %v1787_v35, %v761_v13  ;;  %v804_v2 = vmul.f32 %v1790_v36, %v790_v62  ;;  %v538_v13 = vadd.f32 %v530_v31, %v1728_v9  ;;  %v856_v9 = vpop.f32.mrf.mxu0  ;;  %v898_v31 = vmul.f32 %v1800_v19, %v885_v61 }
 0x157   : > { %v897_v30 = vmul.f32 %v1797_v18, %v856_v9 }
 0x158   : > { %v811_v45 = vadd.f32 %v803_v12, %v719_v28  ;;  %v812_v62 = vadd.f32 %v804_v2, %v720_v14  ;;  %v630_v53 = vadd.f32 %v622_v10, %v538_v13 }
 0x15a   : > { %v903_v20 = vadd.f32 %v895_v50, %v811_v45  ;;  %v904_v59 = vadd.f32 %v896_v51, %v812_v62  ;;  %v722_v4 = vadd.f32 %v714_v3, %v630_v53  ;;  %v888_v24 = vpop.f32.mrf.mxu1 }
 0x15d   : > { %v1772_v16 = vpop.f32.mrf.mxu2  ;;  %v1774_v17 = vpop.f32.mrf.mxu3 }
 0x15e   : > { %v805_v22 = vmul.f32 %v1787_v35, %v1772_v16  ;;  %v806_v32 = vmul.f32 %v1790_v36, %v1774_v17  ;;  %v859_v63 = vpop.f32.mrf.mxu0 }
 0x160   : > { %v813_v39 = vadd.f32 %v805_v22, %v721_v46  ;;  %v814_v26 = vadd.f32 %v806_v32, %v722_v4 }
 0x162   : > { %v905_v6 = vadd.f32 %v897_v30, %v813_v39  ;;  %v906_v7 = vadd.f32 %v898_v31, %v814_v26 }
 0x165   : > { %v1802_v33 = vpop.f32.mrf.mxu2  ;;  %v1804_v38 = vpop.f32.mrf.mxu3 }
 0x16d   : > { %v942_v11 = vpop.f32.mrf.mxu2  ;;  %v971_v1 = vpop.f32.mrf.mxu3 }
 0x16e   : > { %v985_v27 = vmul.f32 %v1818_v34, %v942_v11  ;;  %v986_v54 = vmul.f32 %v1821_v48, %v971_v1 }
 0x170   : > { %v993_v40 = vadd.f32 %v985_v27, %v901_v29  ;;  %v994_v41 = vadd.f32 %v986_v54, %v902_v37  ;;  %v539_v29 = vadd.f32 %v531_v8, %v1734_v42  ;;  %v540_v37 = vadd.f32 %v532_v15, %v1736_v43 }
 0x171   : > { %v807_v42 = vmul.f32 %v1787_v35, %v1802_v33  ;;  %v808_v43 = vmul.f32 %v1790_v36, %v1804_v38  ;;  %v900_v35 = vmul.f32 %v1800_v19, %v888_v24 }
 0x172   : > { %1001 = vst [vmem:[%s1841_s7] sm:$0xff] %v993_v40  ;;  %v631_v11 = vadd.f32 %v623_v47, %v539_v29  ;;  %v632_v1 = vadd.f32 %v624_v5, %v540_v37  ;;  %v899_v40 = vmul.f32 %v1797_v18, %v859_v63 }
 0x173   : > { %1002 = vst [vmem:[%s1841_s7 + $0x8] sm:$0xff] %v994_v41 }
 0x174   : > { %v723_v55 = vadd.f32 %v715_v56, %v631_v11  ;;  %v724_v0 = vadd.f32 %v716_v57, %v632_v1 }
 0x175   : > { %v945_v23 = vpop.f32.mrf.mxu2  ;;  %v974_v58 = vpop.f32.mrf.mxu3 }
 0x176   : > { %v987_v49 = vmul.f32 %v1818_v34, %v945_v23  ;;  %v988_v21 = vmul.f32 %v1821_v48, %v974_v58  ;;  %v815_v28 = vadd.f32 %v807_v42, %v723_v55  ;;  %v816_v14 = vadd.f32 %v808_v43, %v724_v0 }
 0x178   : > { %v995_v16 = vadd.f32 %v987_v49, %v903_v20  ;;  %v996_v17 = vadd.f32 %v988_v21, %v904_v59  ;;  %v907_v38 = vadd.f32 %v899_v40, %v815_v28  ;;  %v908_v41 = vadd.f32 %v900_v35, %v816_v14 }
 0x179   : > { %v1031_v18 = vld [vmem:[%s1841_s7] sm:$0xff] (%p1334_p4) }
 0x17a   : > { %1003 = vst [vmem:[%s1841_s7 + $0x10] sm:$0xff] %v995_v16  ;;  %v1033_v19 = vld [vmem:[%s1841_s7 + $0x8] sm:$0xff] (%p1334_p4) }
 0x17b   : > { %1004 = vst [vmem:[%s1841_s7 + $0x18] sm:$0xff] %v996_v17 }
 0x17c   : > { %1032 = vst [vmem:[%s1018_s14] sm:$0xff] (%p1334_p4), %v1031_v18 }
 0x17d   : > { %v948_v12 = vpop.f32.mrf.mxu2  ;;  %v977_v2 = vpop.f32.mrf.mxu3  ;;  %1034 = vst [vmem:[%s1018_s14 + $0x8] sm:$0xff] (%p1334_p4), %v1033_v19 }
 0x17e   : > { %v989_v27 = vmul.f32 %v1818_v34, %v948_v12  ;;  %v990_v54 = vmul.f32 %v1821_v48, %v977_v2 }
 0x180   : > { %v997_v25 = vadd.f32 %v989_v27, %v905_v6  ;;  %v998_v10 = vadd.f32 %v990_v54, %v906_v7 }
 0x182   : > { %1005 = vst [vmem:[%s1841_s7 + $0x20] sm:$0xff] %v997_v25 }
 0x183   : > { %1006 = vst [vmem:[%s1841_s7 + $0x28] sm:$0xff] %v998_v10 }
 0x185   : > { %v951_v36 = vpop.f32.mrf.mxu2  ;;  %v980_v33 = vpop.f32.mrf.mxu3 }
 0x186   : > { %v991_v44 = vmul.f32 %v1818_v34, %v951_v36  ;;  %v992_v13 = vmul.f32 %v1821_v48, %v980_v33  ;;  %v1035_v34 = vld [vmem:[%s1841_s7 + $0x10] sm:$0xff] (%p1334_p4)  ;;  %v1037_v48 = vld [vmem:[%s1841_s7 + $0x18] sm:$0xff] (%p1334_p4) }
 0x187   : > { %1015 = sbr.rel (!%p1334_p4) target bundleno = 404 (0x194), region = 36  ;;  %1036 = vst [vmem:[%s1018_s14 + $0x30] sm:$0xff] (%p1334_p4), %v1035_v34 }
 0x188   : > { %v999_v45 = vadd.f32 %v991_v44, %v907_v38  ;;  %v1000_v62 = vadd.f32 %v992_v13, %v908_v41  ;;  %1038 = vst [vmem:[%s1018_s14 + $0x38] sm:$0xff] (%p1334_p4), %v1037_v48 }
 0x189   : > { %v1039_v50 = vld [vmem:[%s1841_s7 + $0x20] sm:$0xff] (%p1334_p4) }
 0x18a   : > { %1007 = vst [vmem:[%s1841_s7 + $0x30] sm:$0xff] %v999_v45  ;;  %v1041_v51 = vld [vmem:[%s1841_s7 + $0x28] sm:$0xff] (%p1334_p4) }
 0x18b   : > { %1008 = vst [vmem:[%s1841_s7 + $0x38] sm:$0xff] %v1000_v62 }
 0x18c   : > { %1040 = vst [vmem:[%s1018_s14 + $0x60] sm:$0xff] %v1039_v50 }
 0x18d   : > { %1042 = vst [vmem:[%s1018_s14 + $0x68] sm:$0xff] %v1041_v51 }
 0x191   : > { %v1043_v52 = vld [vmem:[%s1841_s7 + $0x30] sm:$0xff] }
 0x192   : > { %v1045_v53 = vld [vmem:[%s1841_s7 + $0x38] sm:$0xff]  ;;  %1044 = vst [vmem:[%s1018_s14 + $0x90] sm:$0xff] %v1043_v52 }
 0x193   : > { %1046 = vst [vmem:[%s1018_s14 + $0x98] sm:$0xff] %v1045_v53 }
 0x194 PF: > { %p10_p11 = scmp.ge.s32.totalorder %s1324_s13, 5   ;;  %s1915_s9 = smov %s1283_s10 }
 0x195   : > { %s1916_s10 = smov %s1332_s16  ;;  %s1917_s11 = smov %s1324_s13 }
 0x196   :  { %12 = sbr.rel (!%p10_p11) target bundleno = 2 (0x2), region = 87 }
 0x19b   :  { %1062 = vsyncpa [#allocation3], 1 }
 0x19c   :  { %1064 = vsyncpa [#allocation3 + $0x1], 1 }

</bundles_post_ra>
